<compile_context>
chip_gen: v7x
topology: tpu7x:2x2x1
jax: 0.10.0
libtpu: 0.0.40
codegen_flags: <defaults>
</compile_context>

<pallas_src>
import functools

import jax
import jax.numpy as jnp
from jax.experimental import pallas as pl
from jax.experimental.pallas import tpu as pltpu

EPS = 1e-6


def _dice_partial_kernel(x_ref, t_ref, inter_ref, denom_ref, *,
                         normalization, hw, needs_mask):
    """One (batch, tile) grid step.

    x_ref, t_ref : (C, tm, 128) input block of the (B, C, rows, 128) array
    inter_ref    : (C, acc_rows, 128) f32 per-batch partial-sum accumulator
    denom_ref    : (C, acc_rows, 128) f32 per-batch partial-sum accumulator
    """
    k = pl.program_id(1)

    @pl.when(k == 0)
    def _():
        inter_ref[...] = jnp.zeros_like(inter_ref)
        denom_ref[...] = jnp.zeros_like(denom_ref)

    x = x_ref[...].astype(jnp.float32)
    t = t_ref[...].astype(jnp.float32)

    if normalization == 'sigmoid':
        p = jax.nn.sigmoid(x)
    elif normalization == 'softmax':
        # nn.Softmax(dim=1) over channels == axis 0 of the (C, tm, 128)
        # block; the full channel extent is resident, so this is exact.
        p = jax.nn.softmax(x, axis=0)
    else:  # 'none'
        p = x

    pt = p * t
    sq = p * p + t * t

    c, tm, _ = x_ref.shape
    if needs_mask:
        # Zero out spatial positions past the true H*W extent (pad tail of
        # the last 128-lane row and/or garbage rows of a partial last tile).
        row = jax.lax.broadcasted_iota(jnp.int32, (1, tm, 128), 1)
        lane = jax.lax.broadcasted_iota(jnp.int32, (1, tm, 128), 2)
        pos = (k * tm + row) * 128 + lane
        valid = pos < hw
        pt = jnp.where(valid, pt, 0.0)
        sq = jnp.where(valid, sq, 0.0)

    acc_rows = inter_ref.shape[1]
    if tm == acc_rows:
        inter_ref[...] += pt
        denom_ref[...] += sq
    else:
        # VPU-only partial reduce: adds of whole (8,128) vreg slabs along a
        # non-minor axis.  The single cross-lane/sublane reduce happens once
        # in the wrapper, not per block.
        inter_ref[...] += jnp.sum(
            pt.reshape(c, tm // acc_rows, acc_rows, 128), axis=1)
        denom_ref[...] += jnp.sum(
            sq.reshape(c, tm // acc_rows, acc_rows, 128), axis=1)


def dice_loss(x_nchw, target_nchw, normalization='sigmoid', weight=None,
              block_bytes_target=2 * 1024 * 1024):
    assert normalization in ('sigmoid', 'softmax', 'none')
    # TODO(synk): the base class registers an optional per-channel `weight`
    # buffer (None by default); if supplied, fold it into `dice` below.
    assert weight is None

    B, C, H, W = x_nchw.shape
    hw = H * W
    hw_pad = ((hw + 127) // 128) * 128

    # Free reshapes only (no HBM transpose): NCHW -> (B, C, rows, 128).
    x = x_nchw.reshape(B, C, hw)
    t = target_nchw.reshape(B, C, hw)
    if hw_pad != hw:
        # TODO(synk): only spatial extents not divisible by 128 pay this pad.
        pad = ((0, 0), (0, 0), (0, hw_pad - hw))
        x = jnp.pad(x, pad)
        t = jnp.pad(t, pad)
    rows = hw_pad // 128
    x = x.reshape(B, C, rows, 128)
    t = t.reshape(B, C, rows, 128)

    # Tile the row axis: ~block_bytes_target per input block, lane-dense
    # (tm, 128) last dims, tm a multiple of 8 (or the full row extent).
    itemsize = jnp.dtype(x.dtype).itemsize
    tm = max(1, block_bytes_target // (C * 128 * itemsize))
    if tm >= rows:
        tm = rows
    else:
        tm = max(8, (tm // 8) * 8)
    n_tiles = (rows + tm - 1) // tm
    acc_rows = 8 if tm % 8 == 0 else tm
    needs_mask = (hw_pad != hw) or (rows % tm != 0)

    kernel = functools.partial(_dice_partial_kernel,
                               normalization=normalization,
                               hw=hw, needs_mask=needs_mask)

    in_block = (pl.Squeezed(), C, tm, 128)
    out_block = (pl.Squeezed(), C, acc_rows, 128)
    part_shape = jax.ShapeDtypeStruct((B, C, acc_rows, 128), jnp.float32)

    block_bytes = C * tm * 128 * itemsize
    # 2 inputs x 2 pipeline buffers per block + outputs; keep headroom for
    # v7x's 64 MiB physical VMEM.
    vmem_limit = int(min(48 * 2**20, max(16 * 2**20, 8 * block_bytes)))

    inter, denom = pl.pallas_call(
        kernel,
        out_shape=(part_shape, part_shape),
        grid_spec=pltpu.PrefetchScalarGridSpec(
            num_scalar_prefetch=0,
            grid=(B, n_tiles),
            in_specs=[
                pl.BlockSpec(in_block, lambda b, k: (b, 0, k, 0)),
                pl.BlockSpec(in_block, lambda b, k: (b, 0, k, 0)),
            ],
            out_specs=(
                pl.BlockSpec(out_block, lambda b, k: (b, 0, 0, 0)),
                pl.BlockSpec(out_block, lambda b, k: (b, 0, 0, 0)),
            ),
        ),
        compiler_params=pltpu.CompilerParams(
            dimension_semantics=("parallel", "arbitrary"),
            vmem_limit_bytes=vmem_limit),
    )(x, t)

    # Tiny final combine (matches compute_per_channel_dice over the
    # flattened (C, B*H*W) tensors).
    intersect = jnp.sum(inter, axis=(0, 2, 3))                    # (C,)
    denom_sum = jnp.maximum(jnp.sum(denom, axis=(0, 2, 3)), EPS)  # (C,)
    dice = 2.0 * intersect / denom_sum
    return 1.0 - jnp.mean(dice)


def _reference(x_nchw, target_nchw, normalization='sigmoid'):
    B, C, H, W = x_nchw.shape
    if normalization == 'sigmoid':
        p = jax.nn.sigmoid(x_nchw)
    elif normalization == 'softmax':
        p = jax.nn.softmax(x_nchw, axis=1)
    else:
        p = x_nchw
    p = jnp.transpose(p, (1, 0, 2, 3)).reshape(C, -1).astype(jnp.float32)
    t = jnp.transpose(target_nchw, (1, 0, 2, 3)).reshape(C, -1).astype(jnp.float32)
    intersect = jnp.sum(p * t, axis=-1)
    denom = jnp.maximum(jnp.sum(p * p, axis=-1) + jnp.sum(t * t, axis=-1), EPS)
    dice = 2.0 * intersect / denom
    return 1.0 - jnp.mean(dice)


if __name__ == "__main__":
    key = jax.random.PRNGKey(0)
    kx, kt, kx2, kt2 = jax.random.split(key, 4)

    # Case 1: aligned spatial extent, sigmoid normalization.
    B, C, H, W = 2, 4, 16, 16
    x = jax.random.normal(kx, (B, C, H, W), dtype=jnp.float32)
    target = jax.random.bernoulli(kt, 0.5, (B, C, H, W)).astype(jnp.float32)

    out = dice_loss(x, target, normalization='sigmoid')
    out = jax.block_until_ready(out)
    ref = _reference(x, target, normalization='sigmoid')
    assert jnp.allclose(out, ref, atol=1e-5, rtol=1e-5), (out, ref)

    # Case 2: non-128-aligned spatial extent (masking path), softmax.
    B2, C2, H2, W2 = 2, 3, 7, 9
    x2 = jax.random.normal(kx2, (B2, C2, H2, W2), dtype=jnp.float32)
    t2 = jax.random.bernoulli(kt2, 0.5, (B2, C2, H2, W2)).astype(jnp.float32)

    out2 = dice_loss(x2, t2, normalization='softmax')
    out2 = jax.block_until_ready(out2)
    ref2 = _reference(x2, t2, normalization='softmax')
    assert jnp.allclose(out2, ref2, atol=1e-5, rtol=1e-5), (out2, ref2)

    print("KERNEL_OK")
</pallas_src>

<mosaic_0001>
module attributes {stable_mosaic.version = 11 : i64} {
  func.func @_dice_partial_kernel(%arg0: i32, %arg1: i32, %arg2: memref<1x4x2x128xf32, #tpu.memory_space<vmem>>, %arg3: memref<1x4x2x128xf32, #tpu.memory_space<vmem>>, %arg4: memref<1x4x2x128xf32, #tpu.memory_space<vmem>>, %arg5: memref<1x4x2x128xf32, #tpu.memory_space<vmem>>) attributes {dimension_semantics = [#tpu.dimension_semantics<parallel>, #tpu.dimension_semantics<arbitrary>], iteration_bounds = array<i64: 2, 1>, scalar_prefetch = 0 : i64, scratch_operands = 0 : i64, tpu.core_type = #tpu.core_type<tc>, window_params = [{transform_indices = @transform_0, window_bounds = array<i64: 1, 4, 2, 128>}, {transform_indices = @transform_1, window_bounds = array<i64: 1, 4, 2, 128>}, {transform_indices = @transform_2, window_bounds = array<i64: 1, 4, 2, 128>}, {transform_indices = @transform_3, window_bounds = array<i64: 1, 4, 2, 128>}]} {
    %c0_i32 = arith.constant 0 : i32
    %0 = arith.cmpi eq, %arg1, %c0_i32 : i32
    %1 = arith.extui %0 : i1 to i32
    %c0_i32_0 = arith.constant 0 : i32
    %2 = arith.cmpi ne, %1, %c0_i32_0 : i32
    scf.if %2 {
      %cst_24 = arith.constant 0.000000e+00 : f32
      %28 = vector.broadcast %cst_24 : f32 to vector<4x2x128xf32>
      %c0_25 = arith.constant 0 : index
      %c0_26 = arith.constant 0 : index
      %c0_27 = arith.constant 0 : index
      %c0_28 = arith.constant 0 : index
      %29 = vector.load %arg4[%c0_25, %c0_26, %c0_27, %c0_28] : memref<1x4x2x128xf32, #tpu.memory_space<vmem>>, vector<1x4x2x128xf32>
      %30 = vector.shape_cast %29 : vector<1x4x2x128xf32> to vector<4x2x128xf32>
      %31 = vector.shape_cast %28 : vector<4x2x128xf32> to vector<1x4x2x128xf32>
      tpu.vector_store %arg4[%c0_25, %c0_26, %c0_27, %c0_28], %31 {strides = array<i32>} : memref<1x4x2x128xf32, #tpu.memory_space<vmem>>, vector<1x4x2x128xf32>,
      %cst_29 = arith.constant 0.000000e+00 : f32
      %32 = vector.broadcast %cst_29 : f32 to vector<4x2x128xf32>
      %c0_30 = arith.constant 0 : index
      %c0_31 = arith.constant 0 : index
      %c0_32 = arith.constant 0 : index
      %c0_33 = arith.constant 0 : index
      %33 = vector.load %arg5[%c0_30, %c0_31, %c0_32, %c0_33] : memref<1x4x2x128xf32, #tpu.memory_space<vmem>>, vector<1x4x2x128xf32>
      %34 = vector.shape_cast %33 : vector<1x4x2x128xf32> to vector<4x2x128xf32>
      %35 = vector.shape_cast %32 : vector<4x2x128xf32> to vector<1x4x2x128xf32>
      tpu.vector_store %arg5[%c0_30, %c0_31, %c0_32, %c0_33], %35 {strides = array<i32>} : memref<1x4x2x128xf32, #tpu.memory_space<vmem>>, vector<1x4x2x128xf32>,
    } else {
    }
    %c0 = arith.constant 0 : index
    %c0_1 = arith.constant 0 : index
    %c0_2 = arith.constant 0 : index
    %c0_3 = arith.constant 0 : index
    %3 = vector.load %arg2[%c0, %c0_1, %c0_2, %c0_3] : memref<1x4x2x128xf32, #tpu.memory_space<vmem>>, vector<1x4x2x128xf32>
    %4 = vector.shape_cast %3 : vector<1x4x2x128xf32> to vector<4x2x128xf32>
    %c0_4 = arith.constant 0 : index
    %c0_5 = arith.constant 0 : index
    %c0_6 = arith.constant 0 : index
    %c0_7 = arith.constant 0 : index
    %5 = vector.load %arg3[%c0_4, %c0_5, %c0_6, %c0_7] : memref<1x4x2x128xf32, #tpu.memory_space<vmem>>, vector<1x4x2x128xf32>
    %6 = vector.shape_cast %5 : vector<1x4x2x128xf32> to vector<4x2x128xf32>
    %7 = arith.negf %4 : vector<4x2x128xf32>
    %8 = math.exp %7 : vector<4x2x128xf32>
    %cst = arith.constant 1.000000e+00 : f32
    %9 = vector.broadcast %cst : f32 to vector<4x2x128xf32>
    %10 = arith.addf %9, %8 : vector<4x2x128xf32>
    %11 = arith.divf %9, %10 : vector<4x2x128xf32>
    %12 = arith.mulf %11, %6 : vector<4x2x128xf32>
    %13 = arith.mulf %11, %11 : vector<4x2x128xf32>
    %14 = arith.mulf %6, %6 : vector<4x2x128xf32>
    %15 = arith.addf %13, %14 : vector<4x2x128xf32>
    %c0_8 = arith.constant 0 : index
    %c0_9 = arith.constant 0 : index
    %c0_10 = arith.constant 0 : index
    %c0_11 = arith.constant 0 : index
    %16 = vector.load %arg4[%c0_8, %c0_9, %c0_10, %c0_11] : memref<1x4x2x128xf32, #tpu.memory_space<vmem>>, vector<1x4x2x128xf32>
    %17 = vector.shape_cast %16 : vector<1x4x2x128xf32> to vector<4x2x128xf32>
    %18 = arith.addf %17, %12 : vector<4x2x128xf32>
    %c0_12 = arith.constant 0 : index
    %c0_13 = arith.constant 0 : index
    %c0_14 = arith.constant 0 : index
    %c0_15 = arith.constant 0 : index
    %19 = vector.load %arg4[%c0_12, %c0_13, %c0_14, %c0_15] : memref<1x4x2x128xf32, #tpu.memory_space<vmem>>, vector<1x4x2x128xf32>
    %20 = vector.shape_cast %19 : vector<1x4x2x128xf32> to vector<4x2x128xf32>
    %21 = vector.shape_cast %18 : vector<4x2x128xf32> to vector<1x4x2x128xf32>
    tpu.vector_store %arg4[%c0_12, %c0_13, %c0_14, %c0_15], %21 {strides = array<i32>} : memref<1x4x2x128xf32, #tpu.memory_space<vmem>>, vector<1x4x2x128xf32>,
    %c0_16 = arith.constant 0 : index
    %c0_17 = arith.constant 0 : index
    %c0_18 = arith.constant 0 : index
    %c0_19 = arith.constant 0 : index
    %22 = vector.load %arg5[%c0_16, %c0_17, %c0_18, %c0_19] : memref<1x4x2x128xf32, #tpu.memory_space<vmem>>, vector<1x4x2x128xf32>
    %23 = vector.shape_cast %22 : vector<1x4x2x128xf32> to vector<4x2x128xf32>
    %24 = arith.addf %23, %15 : vector<4x2x128xf32>
    %c0_20 = arith.constant 0 : index
    %c0_21 = arith.constant 0 : index
    %c0_22 = arith.constant 0 : index
    %c0_23 = arith.constant 0 : index
    %25 = vector.load %arg5[%c0_20, %c0_21, %c0_22, %c0_23] : memref<1x4x2x128xf32, #tpu.memory_space<vmem>>, vector<1x4x2x128xf32>
    %26 = vector.shape_cast %25 : vector<1x4x2x128xf32> to vector<4x2x128xf32>
    %27 = vector.shape_cast %24 : vector<4x2x128xf32> to vector<1x4x2x128xf32>
    tpu.vector_store %arg5[%c0_20, %c0_21, %c0_22, %c0_23], %27 {strides = array<i32>} : memref<1x4x2x128xf32, #tpu.memory_space<vmem>>, vector<1x4x2x128xf32>,
    return
  }
  func.func @transform_0(%arg0: i32, %arg1: i32) -> (i32, i32, i32, i32) {
    %c0_i32 = arith.constant 0 : i32
    %c0_i32_0 = arith.constant 0 : i32
    %c0_i32_1 = arith.constant 0 : i32
    return %arg0, %c0_i32, %arg1, %c0_i32_0 : i32, i32, i32, i32
  }
  func.func @transform_1(%arg0: i32, %arg1: i32) -> (i32, i32, i32, i32) {
    %c0_i32 = arith.constant 0 : i32
    %c0_i32_0 = arith.constant 0 : i32
    %c0_i32_1 = arith.constant 0 : i32
    return %arg0, %c0_i32, %arg1, %c0_i32_0 : i32, i32, i32, i32
  }
  func.func @transform_2(%arg0: i32, %arg1: i32) -> (i32, i32, i32, i32) {
    %c0_i32 = arith.constant 0 : i32
    %c0_i32_0 = arith.constant 0 : i32
    %c0_i32_1 = arith.constant 0 : i32
    %c0_i32_2 = arith.constant 0 : i32
    return %arg0, %c0_i32, %c0_i32_0, %c0_i32_1 : i32, i32, i32, i32
  }
  func.func @transform_3(%arg0: i32, %arg1: i32) -> (i32, i32, i32, i32) {
    %c0_i32 = arith.constant 0 : i32
    %c0_i32_0 = arith.constant 0 : i32
    %c0_i32_1 = arith.constant 0 : i32
    %c0_i32_2 = arith.constant 0 : i32
    return %arg0, %c0_i32, %c0_i32_0, %c0_i32_1 : i32, i32, i32, i32
  }
}

</mosaic_0001>

<bundles_post_ra>
// kernel: tpu_custom_call.1
= control target key start
LH: loop header
LB: loop body
LE: loop exit
PB: predicated region body
PF: predicated region fallthrough
CT: control target
= control target key end

     0   :  { %9 = vsyncpa [#allocation3], 0  ;;  %s1163_s0 = inlined_call_operand.hbm [shape: f32[2,4,2,128], index: 0, kind: input, shape index: {}]   ;;  %s1164_s1 = inlined_call_operand.hbm [shape: f32[2,4,2,128], index: 1, kind: input, shape index: {}]   ;;  %s1165_s2 = inlined_call_operand.hbm [shape: f32[2,4,2,128], index: 2, kind: output, shape index: {0}]   ;;  %s1166_s3 = inlined_call_operand.hbm [shape: f32[2,4,2,128], index: 3, kind: output, shape index: {1}]  }
   0x1   :  { %11 = vsyncpa [#allocation3 + $0x1], 0 }
   0x2   :  { %12 = vsyncpa [#allocation6], 0 }
   0x3   :  { %14 = vsyncpa [#allocation6 + $0x1], 0 }
   0x4   :  { %15 = vsyncpa [#allocation4], 0 }
   0x5   :  { %17 = vsyncpa [#allocation4 + $0x1], 0 }
   0x6   :  { %18 = vsyncpa [#allocation9], 0 }
   0x7   :  { %20 = vsyncpa [#allocation9 + $0x1], 0  ;;  %s850_s12 = smov 0   ;;  %s852_s13 = smov 0  }
   0x8   :  { %s854_s14 = smov 0   ;;  %s856_s15 = smov 0  }
   0x9   :  { %s858_s16 = smov 0   ;;  %s860_s17 = smov 0  }
   0xa LB: > { %s517_s18 = sadd.s32 4294967295, %s819_s17   ;;  %s518_s19 = sadd.s32 4294967294, %s819_s17   ;;  %s819_s17 = sphi %s860_s17, %s26_s17   ;;  %s815_s16 = sphi %s858_s16, %s1184_s16   ;;  %s811_s15 = sphi %s856_s15, %s1183_s15   ;;  %s807_s14 = sphi %s854_s14, %s1182_s14   ;;  %s803_s13 = sphi %s852_s13, %s1181_s13   ;;  %s799_s12 = sphi %s850_s12, %s1180_s12  }
   0xb   : > { %s38_s20 = sadd.s32 1, %s815_s16  ;;  %s47_s21 = sadd.s32 1, %s807_s14 }
   0xc   : > { %p40_p0 = scmp.ge.s32.totalorder %s38_s20, 2  ;;  %p54_p1 = scmp.ne.s32.totalorder %s807_s14, %s803_s13 }
   0xd   : > { %p55_p2 = scmp.eq.s32.totalorder %s819_s17, 0  ;;  %p60_p3 = scmp.ne.s32.totalorder %s803_s13, %s799_s12 }
   0xe   : > { %s1186_s20 = smov (%p40_p0, %s38_s20), 0  ;;  %p61_p5 = scmp.eq.s32.totalorder %s517_s18, 0 }
   0xf   : > { %p891_p4 = por %p55_p2, %p54_p1  ;;  %s42_s23 = ssub.s32 %s815_s16, %s1186_s20 }
  0x10   : > { %p112_p6 = scmp.eq.s32.totalorder %s517_s18, 1  ;;  %p45_p7 = scmp.eq.s32.totalorder %s42_s23, 0 }
  0x11   : > { %p897_p8 = por %p61_p5, %p60_p3  ;;  %p118_p10 = scmp.eq.s32.totalorder %s518_s19, 1 }
  0x12   : > { %p901_p9 = por %p112_p6, %p54_p1  ;;  %p570_p13 = scmp.lt.s32.totalorder %s819_s17, 2 }
  0x13   : > { %s1170_s24 = scalar_select %p897_p8, 1, 0 }
  0x14   : > { %s1171_s25 = scalar_select %p901_p9, 1, 0 }
  0x15   : > { %s906_s26 = scalar_select %p45_p7, %s807_s14, %s47_s21  }
  0x16   : > { %p908_p11 = por %p118_p10, %p60_p3  ;;  %s915_s28 = sand.u32 1, %s807_s14  }
  0x17   : > { %s521_s29 = sshll.u32 %s915_s28, 3  ;;  %s544_s30 = sshll.u32 %s815_s16, 7 }
  0x18   : > { %s1172_s27 = scalar_select %p908_p11, 1, 0 }
  0x19   : > { %s924_s6 = scalar_lea.hbm %s1163_s0, %s544_s30  ;;  %s168_s7 = scalar_lea.vmem [#allocation2], %s521_s29 }
  0x1a   : > { %s176_s8 = sshll.u32 %s168_s7, 4  ;;  %p932_p0 = pnand %p570_p13, %p891_p4  ;;  %s928_s8 = int_to_ptr.vmem [resolvable:$true] %s176_s8 }
  0x1b   : > { %s165_s10 = scalar_lea.sflag [#allocation3], %s915_s28  ;;  %s641_s11 = scalar_lea.hbm %s924_s6, 128 }
  0x1c   : > { %p642_p2 = scmp.ne.s32.totalorder %s924_s6, %s641_s11  ;;  %p643_p3 = pneg %p932_p0 }
  0x1d   : > { %s646_s21 = scalar_lea.hbm %s1163_s0, 256  ;;  %p647_p4 = scmp.lt.u32.totalorder %s924_s6, %s1163_s0 }
  0x1e   : > { %p644_p5 = pnand %p643_p3, %p642_p2  ;;  %p648_p7 = scmp.lt.u32.totalorder %s646_s21, %s641_s11 }
  0x1f   : > { %p650_p13 = scmp.lt.u32.totalorder %s641_s11, %s924_s6 }
  0x20   : > { %p645_p6 = pneg %p644_p5  ;;  %p649_p10 = por %p648_p7, %p647_p4 }
  0x22   : > { %p651_p12 = por %p650_p13, %p649_p10 }
  0x24   : > { %p652_p1 = pnand %p651_p12, %p645_p6 }
  0x26   : > { %655 = shalt.err (!%p652_p1)
}
  0x27   : > { %s656_s4 = scalar_lea.vmem %s928_s8, 128  ;;  %s821_s5 = smov [#allocation2]  }
  0x28   : > { %p657_p2 = scmp.ne.s32.totalorder %s928_s8, %s656_s4  ;;  %s661_s7 = sshll.u32 %s821_s5, 4  ;;  %s662_s7 = int_to_ptr.vmem [resolvable:$false] %s661_s7 }
  0x29   : > { %s663_s18 = scalar_lea.vmem %s662_s7, 256  ;;  %p664_p9 = scmp.lt.s32.totalorder %s928_s8, %s662_s7 }
  0x2a   : > { %p659_p5 = pnand %p657_p2, %p643_p3  ;;  %p665_p4 = scmp.lt.s32.totalorder %s663_s18, %s656_s4 }
  0x2c   : > { %p660_p11 = pneg %p659_p5  ;;  %p666_p7 = por %p665_p4, %p664_p9 }
  0x2e   : > { %p667_p10 = pnand %p666_p7, %p660_p11 }
  0x30   : > { %670 = shalt.err (!%p667_p10)
}
  0x31   : > { %s822_s11 = smov 32   ;;  %s823_s19 = smov 2  }
  0x32   : > { %559 = dma.hbm_to_vmem [thread:$0]  (!%p932_p0), %s924_s6, 128, %s928_s8, %s165_s10, %s822_s11, %s822_s11, %s823_s19  }
  0x33   : > { %p206_p9 = scmp.lt.s32.totalorder %s819_s17, 3  ;;  %s974_s23 = scalar_lea.hbm %s1164_s1, %s544_s30 }
  0x34   : > { %p1174_p11 = scmp.ge.s32.totalorder %s819_s17, 1  ;;  %s190_s5 = scalar_lea.vmem [#allocation5], %s521_s29 }
  0x35   : > { %s198_s7 = sshll.u32 %s190_s5, 4  ;;  %s187_s6 = scalar_lea.sflag [#allocation6], %s915_s28  ;;  %s984_s7 = int_to_ptr.vmem [resolvable:$true] %s198_s7 }
  0x36   : > { %p978_p12 = pnand %p1174_p11, %p206_p9  ;;  %s671_s8 = scalar_lea.hbm %s974_s23, 128 }
  0x37   : > { %p672_p1 = scmp.ne.s32.totalorder %s974_s23, %s671_s8  ;;  %s676_s18 = scalar_lea.hbm %s1164_s1, 256 }
  0x38   : > { %p677_p2 = scmp.lt.u32.totalorder %s974_s23, %s1164_s1  ;;  %p678_p5 = scmp.lt.u32.totalorder %s676_s18, %s671_s8 }
  0x39   : > { %p674_p6 = pnand %p672_p1, %p643_p3  ;;  %p680_p7 = scmp.lt.u32.totalorder %s671_s8, %s974_s23 }
  0x3a   : > { %p679_p4 = por %p678_p5, %p677_p2 }
  0x3b   : > { %p675_p13 = pneg %p674_p6 }
  0x3c   : > { %p681_p10 = por %p680_p7, %p679_p4 }
  0x3e   : > { %p682_p9 = pnand %p681_p10, %p675_p13 }
  0x40   : > { %685 = shalt.err (!%p682_p9)
}
  0x41   : > { %s686_s29 = scalar_lea.vmem %s984_s7, 128  ;;  %s824_s5 = smov [#allocation5]  }
  0x42   : > { %p687_p11 = scmp.ne.s32.totalorder %s984_s7, %s686_s29  ;;  %s691_s30 = sshll.u32 %s824_s5, 4  ;;  %s692_s30 = int_to_ptr.vmem [resolvable:$false] %s691_s30 }
  0x43   : > { %s693_s10 = scalar_lea.vmem %s692_s30, 256  ;;  %p694_p8 = scmp.lt.s32.totalorder %s984_s7, %s692_s30 }
  0x44   : > { %p689_p1 = pnand %p687_p11, %p643_p3  ;;  %p695_p2 = scmp.lt.s32.totalorder %s693_s10, %s686_s29 }
  0x46   : > { %p690_p6 = pneg %p689_p1  ;;  %p696_p5 = por %p695_p2, %p694_p8 }
  0x48   : > { %p697_p4 = pnand %p696_p5, %p690_p6 }
  0x4a   : > { %700 = shalt.err (!%p697_p4)
}
  0x4b   : > { %562 = dma.hbm_to_vmem [thread:$0]  (!%p932_p0), %s974_s23, 128, %s984_s7, %s187_s6, %s822_s11, %s822_s11, %s823_s19  }
  0x4c   : > { %210 = sbr.rel (%p978_p12) target bundleno = 161 (0xa1), region = 28  ;;  %s1018_s8 = sand.u32 (!%p978_p12), 1, %s803_s13  }
  0x4d   : > { %s528_s18 = sshll.u32 (!%p978_p12), %s1018_s8, 3  ;;  %s213_s21 = scalar_lea.sflag (!%p978_p12), [#allocation3], %s1018_s8 }
  0x4e   : > { %s216_s9 = scalar_lea.vmem (!%p978_p12), [#allocation2], %s528_s18  ;;  %p1176_p8 = scmp.ne.s32.totalorder (!%p978_p12), %s1170_s24, 0 }
  0x53   : > { %782 = dma.done.wait (%p1176_p8), %s213_s21, 128  }
  0x54   : > { %784 = vsyncadd (%p1176_p8), %s213_s21, 4294967168  ;;  %s222_s28 = scalar_lea.sflag [#allocation6], %s1018_s8  ;;  %s1027_s11 = scalar_lea.vmem [#allocation5], %s528_s18 }
  0x55   : > { %786 = dma.done.wait (%p1176_p8), %s222_s28, 128  }
  0x56   : > { %788 = vsyncadd (%p1176_p8), %s222_s28, 4294967168  ;;  %s1033_s19 = scalar_lea.vmem [#allocation7], %s528_s18  ;;  %v825_v0 = vmov 0.0   ;;  %s1039_s23 = scalar_lea.vmem [#allocation8], %s528_s18  ;;  %v270_v1 = vld [vmem:[%s216_s9] sm:$0x3] }
  0x57   : > { %262 = vst [vmem:[%s1033_s19] sm:$0x3] %v825_v0  ;;  %263 = vst [vmem:[%s1033_s19 + $0x2] sm:$0x3] %v825_v0  ;;  %v271_v2 = vld [vmem:[%s216_s9 + $0x2] sm:$0x3]  ;;  %s546_s24 = sshll.u32 %s811_s15, 7 }
  0x58   : > { %264 = vst [vmem:[%s1033_s19 + $0x4] sm:$0x3] %v825_v0  ;;  %265 = vst [vmem:[%s1033_s19 + $0x6] sm:$0x3] %v825_v0  ;;  %v532_v3 = vmul.f32 -1.442695, %v270_v1  ;;  %s1064_s22 = scalar_lea.hbm %s1165_s2, %s546_s24  ;;  %s1081_s10 = scalar_lea.hbm %s1166_s3, %s546_s24 }
  0x59   : > { %266 = vst [vmem:[%s1039_s23] sm:$0x3] %v825_v0  ;;  %267 = vst [vmem:[%s1039_s23 + $0x2] sm:$0x3] %v825_v0  ;;  %v533_v4 = vmul.f32 -1.442695, %v271_v2  ;;  %s361_s4 = sshll.u32 %s1033_s19, 4  ;;  %s1067_s4 = int_to_ptr.vmem [resolvable:$true] %s361_s4 }
  0x5a   : > { %268 = vst [vmem:[%s1039_s23 + $0x4] sm:$0x3] %v825_v0  ;;  %269 = vst [vmem:[%s1039_s23 + $0x6] sm:$0x3] %v825_v0  ;;  %v272_v5 = vld [vmem:[%s216_s9 + $0x4] sm:$0x3]  ;;  %625 = vpow2.f32 %v532_v3 }
  0x5b   : > { %v534_v6 = vmul.f32 -1.442695, %v272_v5  ;;  %627 = vpow2.f32 %v533_v4  ;;  %v273_v7 = vld [vmem:[%s216_s9 + $0x6] sm:$0x3]  ;;  %v274_v17 = vld [vmem:[%s1027_s11] sm:$0x3] }
  0x5c   : > { %v535_v8 = vmul.f32 -1.442695, %v273_v7  ;;  %v275_v18 = vld [vmem:[%s1027_s11 + $0x2] sm:$0x3]  ;;  %v276_v19 = vld [vmem:[%s1027_s11 + $0x4] sm:$0x3]  ;;  %v310_v20 = vmul.f32 %v274_v17, %v274_v17 }
  0x5d   : > { %629 = vpow2.f32 %v534_v6  ;;  %v311_v23 = vmul.f32 %v275_v18, %v275_v18  ;;  %v277_v27 = vld [vmem:[%s1027_s11 + $0x6] sm:$0x3]  ;;  %v312_v29 = vmul.f32 %v276_v19, %v276_v19  ;;  %s377_s29 = sshll.u32 %s1039_s23, 4  ;;  %s343_s18 = scalar_lea.sflag [#allocation4], %s1018_s8  ;;  %s1083_s29 = int_to_ptr.vmem [resolvable:$true] %s377_s29 }
  0x5e   : > { %631 = vpow2.f32 %v535_v8  ;;  %v318_v22 = vld [vmem:[%s1033_s19] sm:$0x3]  ;;  %v319_v26 = vld [vmem:[%s1033_s19 + $0x2] sm:$0x3]  ;;  %v313_v45 = vmul.f32 %v277_v27, %v277_v27  ;;  %s701_s21 = scalar_lea.vmem %s1067_s4, 128  ;;  %p1177_p3 = scmp.ne.s32.totalorder %s1171_s25, 0 }
  0x5f   : > { %v320_v32 = vld [vmem:[%s1033_s19 + $0x4] sm:$0x3]  ;;  %v321_v42 = vld [vmem:[%s1033_s19 + $0x6] sm:$0x3]  ;;  %p702_p0 = scmp.ne.s32.totalorder %s1067_s4, %s701_s21  ;;  %s826_s9 = smov [#allocation7]  }
  0x60   : > { %v330_v33 = vld [vmem:[%s1039_s23] sm:$0x3]  ;;  %v331_v38 = vld [vmem:[%s1039_s23 + $0x2] sm:$0x3]  ;;  %s705_s28 = sshll.u32 %s826_s9, 4  ;;  %s706_s28 = int_to_ptr.vmem [resolvable:$false] %s705_s28 }
  0x61   : > { %v332_v44 = vld [vmem:[%s1039_s23 + $0x4] sm:$0x3]  ;;  %v333_v54 = vld [vmem:[%s1039_s23 + $0x6] sm:$0x3]  ;;  %p703_p12 = pnand %p702_p0, %p1177_p3  ;;  %s707_s11 = scalar_lea.vmem %s706_s28, 256 }
  0x62   : > { %p708_p7 = scmp.lt.s32.totalorder %s1067_s4, %s706_s28  ;;  %p709_p10 = scmp.lt.s32.totalorder %s707_s11, %s701_s21 }
  0x63   : > { %p704_p13 = pneg %p703_p12 }
  0x64   : > { %v626_v9 = vpop.eup %625  ;;  %p710_p9 = por %p709_p10, %p708_p7 }
  0x65   : > { %v628_v10 = vpop.eup %627  ;;  %v290_v11 = vadd.f32 1.0, %v626_v9 }
  0x66   : > { %v291_v13 = vadd.f32 1.0, %v628_v10  ;;  %p711_p11 = pnand %p710_p9, %p704_p13 }
  0x67   : > { %v630_v12 = vpop.eup %629  ;;  %633 = vrcp.f32 %v290_v11 }
  0x68   : > { %v292_v14 = vadd.f32 1.0, %v630_v12  ;;  %v632_v15 = vpop.eup %631  ;;  %635 = vrcp.f32 %v291_v13 }
  0x69   : > { %v293_v16 = vadd.f32 1.0, %v632_v15 }
  0x6a   : > { %637 = vrcp.f32 %v292_v14 }
  0x6b   : > { %639 = vrcp.f32 %v293_v16 }
  0x71   : > { %v634_v21 = vpop.eup %633 }
  0x72   : > { %v636_v24 = vpop.eup %635  ;;  %v302_v25 = vmul.f32 %v634_v21, %v274_v17  ;;  %v306_v28 = vmul.f32 %v634_v21, %v634_v21 }
  0x73   : > { %v303_v31 = vmul.f32 %v636_v24, %v275_v18  ;;  %v307_v34 = vmul.f32 %v636_v24, %v636_v24 }
  0x74   : > { %v638_v30 = vpop.eup %637  ;;  %v322_v35 = vadd.f32 %v318_v22, %v302_v25  ;;  %v314_v37 = vadd.f32 %v310_v20, %v306_v28 }
  0x75   : > { %v304_v36 = vmul.f32 %v638_v30, %v276_v19  ;;  %v308_v39 = vmul.f32 %v638_v30, %v638_v30  ;;  %v640_v40 = vpop.eup %639  ;;  %v323_v41 = vadd.f32 %v319_v26, %v303_v31  ;;  %v315_v43 = vadd.f32 %v311_v23, %v307_v34 }
  0x76   : > { %326 = vst [vmem:[%s1033_s19] sm:$0x3] %v322_v35  ;;  %v305_v47 = vmul.f32 %v640_v40, %v277_v27  ;;  %v334_v48 = vadd.f32 %v330_v33, %v314_v37  ;;  %v309_v51 = vmul.f32 %v640_v40, %v640_v40 }
  0x77   : > { %v324_v46 = vadd.f32 %v320_v32, %v304_v36  ;;  %v316_v49 = vadd.f32 %v312_v29, %v308_v39  ;;  %327 = vst [vmem:[%s1033_s19 + $0x2] sm:$0x3] %v323_v41  ;;  %v335_v50 = vadd.f32 %v331_v38, %v315_v43 }
  0x78   : > { %v325_v52 = vadd.f32 %v321_v42, %v305_v47  ;;  %338 = vst [vmem:[%s1039_s23] sm:$0x3] %v334_v48  ;;  %v317_v55 = vadd.f32 %v313_v45, %v309_v51 }
  0x79   : > { %328 = vst [vmem:[%s1033_s19 + $0x4] sm:$0x3] %v324_v46  ;;  %v336_v53 = vadd.f32 %v332_v44, %v316_v49  ;;  %339 = vst [vmem:[%s1039_s23 + $0x2] sm:$0x3] %v335_v50 }
  0x7a   : > { %329 = vst [vmem:[%s1033_s19 + $0x6] sm:$0x3] %v325_v52  ;;  %v337_v56 = vadd.f32 %v333_v54, %v317_v55 }
  0x7b   : > { %340 = vst [vmem:[%s1039_s23 + $0x4] sm:$0x3] %v336_v53 }
  0x7c   : > { %714 = shalt.err (!%p711_p11)
}
  0x7d   : > { %s715_s15 = scalar_lea.hbm %s1064_s22, 128  ;;  %s719_s7 = scalar_lea.hbm %s1165_s2, 256 }
  0x7e   : > { %p716_p1 = scmp.ne.s32.totalorder %s1064_s22, %s715_s15  ;;  %p720_p5 = scmp.lt.u32.totalorder %s1064_s22, %s1165_s2 }
  0x7f   : > { %p721_p4 = scmp.lt.u32.totalorder %s719_s7, %s715_s15  ;;  %p723_p0 = scmp.lt.u32.totalorder %s715_s15, %s1064_s22 }
  0x80   : > { %p717_p6 = pnand %p716_p1, %p1177_p3 }
  0x81   : > { %p722_p8 = por %p721_p4, %p720_p5 }
  0x82   : > { %p718_p2 = pneg %p717_p6 }
  0x83   : > { %p724_p12 = por %p723_p0, %p722_p8 }
  0x85   : > { %p725_p13 = pnand %p724_p12, %p718_p2 }
  0x87   : > { %728 = shalt.err (!%p725_p13)
}
  0x88   : > { %s827_s30 = smov 32   ;;  %s828_s21 = smov 2   ;;  %341 = vst [vmem:[%s1039_s23 + $0x6] sm:$0x3] %v337_v56 }
  0x89   : > { %552 = dma.vmem_to_hbm [thread:$0]  (%p1177_p3), %s1067_s4, 128, %s1064_s22, %s343_s18, %s827_s30, %s827_s30, %s828_s21  }
  0x8a   : > { %s348_s9 = scalar_lea.sflag [#allocation9], %s1018_s8  ;;  %s729_s28 = scalar_lea.vmem %s1083_s29, 128 }
  0x8b   : > { %p730_p7 = scmp.ne.s32.totalorder %s1083_s29, %s729_s28  ;;  %s829_s11 = smov [#allocation8]  }
  0x8c   : > { %s733_s15 = sshll.u32 %s829_s11, 4  ;;  %s734_s15 = int_to_ptr.vmem [resolvable:$false] %s733_s15 }
  0x8d   : > { %p731_p10 = pnand %p730_p7, %p1177_p3  ;;  %s735_s19 = scalar_lea.vmem %s734_s15, 256 }
  0x8e   : > { %p736_p11 = scmp.lt.s32.totalorder %s1083_s29, %s734_s15  ;;  %p737_p1 = scmp.lt.s32.totalorder %s735_s19, %s729_s28 }
  0x8f   : > { %p732_p9 = pneg %p731_p10 }
  0x90   : > { %p738_p6 = por %p737_p1, %p736_p11 }
  0x92   : > { %p739_p2 = pnand %p738_p6, %p732_p9 }
  0x94   : > { %742 = shalt.err (!%p739_p2)
}
  0x95   : > { %s743_s23 = scalar_lea.hbm %s1081_s10, 128  ;;  %s747_s18 = scalar_lea.hbm %s1166_s3, 256 }
  0x96   : > { %p744_p5 = scmp.ne.s32.totalorder %s1081_s10, %s743_s23  ;;  %p748_p0 = scmp.lt.u32.totalorder %s1081_s10, %s1166_s3 }
  0x97   : > { %p749_p12 = scmp.lt.u32.totalorder %s747_s18, %s743_s23  ;;  %p751_p7 = scmp.lt.u32.totalorder %s743_s23, %s1081_s10 }
  0x98   : > { %p745_p4 = pnand %p744_p5, %p1177_p3 }
  0x99   : > { %p750_p13 = por %p749_p12, %p748_p0 }
  0x9a   : > { %p746_p8 = pneg %p745_p4 }
  0x9b   : > { %p752_p10 = por %p751_p7, %p750_p13 }
  0x9d   : > { %p753_p9 = pnand %p752_p10, %p746_p8 }
  0x9f   : > { %756 = shalt.err (!%p753_p9)
}
  0xa0   : > { %553 = dma.vmem_to_hbm [thread:$0]  (%p1177_p3), %s1083_s29, 128, %s1081_s10, %s348_s9, %s827_s30, %s827_s30, %s828_s21  }
  0xa1 PF: > { %s392_s6 = sand.u32 1, %s799_s12   ;;  %p1178_p11 = scmp.ne.s32.totalorder %s1172_s27, 0 }
  0xa2   : > { %p1179_p1 = scmp.ge.s32.totalorder %s819_s17, 2  ;;  %s393_s5 = scalar_lea.sflag [#allocation4], %s392_s6 }
  0xa4   : > { %p564_p6 = pnand %p1179_p1, %p1178_p11 }
  0xa6   : > { %790 = dma.done.wait (!%p564_p6), %s393_s5, 128  }
  0xa7   : > { %792 = vsyncadd (!%p564_p6), %s393_s5, 4294967168  ;;  %s402_s25 = scalar_lea.sflag [#allocation9], %s392_s6 }
  0xa8   : > { %794 = dma.done.wait (!%p564_p6), %s402_s25, 128  }
  0xa9   : > { %796 = vsyncadd (!%p564_p6), %s402_s25, 4294967168  ;;  %s26_s17 = sadd.s32 1, %s819_s17   ;;  %s1180_s12 = smov %s803_s13 }
  0xaa   : > { %p23_p2 = scmp.ge.s32.totalorder %s26_s17, 4   ;;  %s1181_s13 = smov %s807_s14 }
  0xab   : > { %s1182_s14 = smov %s906_s26  ;;  %s1183_s15 = smov %s815_s16 }
  0xac   : > { %s1184_s16 = smov %s1186_s20  ;;  %25 = sbr.rel (!%p23_p2) target bundleno = 10 (0xa), region = 107 }
  0xb3   :  { %407 = vsyncpa [#allocation3], 1 }
  0xb4   :  { %409 = vsyncpa [#allocation3 + $0x1], 1 }
  0xb5   :  { %410 = vsyncpa [#allocation6], 1 }
  0xb6   :  { %412 = vsyncpa [#allocation6 + $0x1], 1 }
  0xb7   :  { %413 = vsyncpa [#allocation4], 1 }
  0xb8   :  { %415 = vsyncpa [#allocation4 + $0x1], 1 }
  0xb9   :  { %416 = vsyncpa [#allocation9], 1 }
  0xba   :  { %418 = vsyncpa [#allocation9 + $0x1], 1 }

</bundles_post_ra>
